<compile_context>
chip_gen: v7x
topology: tpu7x:2x2x1
jax: 0.10.0
libtpu: 0.0.40
codegen_flags: <defaults>
</compile_context>

<pallas_src>
import jax
import jax.numpy as jnp
from jax.experimental import pallas as pl
from jax.experimental.pallas import tpu as pltpu


# ----------------------------- helpers -----------------------------

def _round_up(n, m):
    return ((n + m - 1) // m) * m


def _interp_matrix(out_size, in_size):
    """Bilinear sampling matrix (align_corners=False), shape (out_size, in_size)."""
    i = jnp.arange(out_size, dtype=jnp.float32)
    src = (i + 0.5) * (in_size / out_size) - 0.5
    i0 = jnp.floor(src)
    frac = src - i0
    i0c = jnp.clip(i0, 0, in_size - 1).astype(jnp.int32)
    i1c = jnp.clip(i0 + 1, 0, in_size - 1).astype(jnp.int32)
    rows = (jax.nn.one_hot(i0c, in_size, dtype=jnp.float32) * (1.0 - frac)[:, None]
            + jax.nn.one_hot(i1c, in_size, dtype=jnp.float32) * frac[:, None])
    return rows


# ----------------------------- Pallas kernel -----------------------------

def _dual_mlp_kernel(counts_ref, x_ref, we_ref, be_ref, wl_ref, bl_ref,
                     logits_ref, emb_ref, acc_ref):
    # grid = (branch i, F-tile k); counts_ref[i] = number of real F tiles of branch i.
    i = pl.program_id(0)
    k = pl.program_id(1)
    n_k = counts_ref[i]

    @pl.when(k == 0)
    def _init():
        acc_ref[...] = jnp.zeros_like(acc_ref)

    @pl.when(k < n_k)
    def _accumulate():
        # f32 activations x bf16 weights (upcast the small streamed tile), f32 accumulate.
        acc_ref[...] += jnp.dot(x_ref[0], we_ref[0].astype(jnp.float32),
                                preferred_element_type=jnp.float32)

    @pl.when(k == n_k - 1)
    def _finalize():
        h = jnp.maximum(acc_ref[...] + be_ref[0], 0.0)      # post-activation embeddings
        emb_ref[0] = h
        logits_ref[0] = (jnp.dot(h, wl_ref[0].astype(jnp.float32),
                                 preferred_element_type=jnp.float32) + bl_ref[0])


def fused_dual_mlp(kf_counts, x_stack, we_stack, be_stack, wl_stack, bl_stack,
                   *, f_tile):
    """Single launch: both branches (axis 0, 'parallel') x F tiles (axis 1, 'arbitrary')."""
    _, n_pad, f_pad = x_stack.shape
    d_pad = we_stack.shape[2]
    k_pad = wl_stack.shape[2]
    kf_max = f_pad // f_tile

    # Clamp skipped tiles to the branch's last real tile so the DMA is elided
    # (unchanged block index) and no zero-padded weight bytes are streamed.
    def x_map(i, k, counts):
        return (i, 0, jnp.minimum(k, counts[i] - 1))

    def we_map(i, k, counts):
        return (i, jnp.minimum(k, counts[i] - 1), 0)

    def bcast_map(i, k, counts):
        return (i, 0, 0)

    grid_spec = pltpu.PrefetchScalarGridSpec(
        num_scalar_prefetch=1,
        grid=(2, kf_max),
        in_specs=[
            pl.BlockSpec((1, n_pad, f_tile), x_map),        # activations (f32)
            pl.BlockSpec((1, f_tile, d_pad), we_map),       # embed weights (bf16)
            pl.BlockSpec((1, 1, d_pad), bcast_map),         # embed bias   (f32)
            pl.BlockSpec((1, d_pad, k_pad), bcast_map),     # logit weights (bf16)
            pl.BlockSpec((1, 1, k_pad), bcast_map),         # logit bias   (f32)
        ],
        out_specs=(
            pl.BlockSpec((1, n_pad, k_pad), bcast_map),     # logits
            pl.BlockSpec((1, n_pad, d_pad), bcast_map),     # embeddings
        ),
        scratch_shapes=[pltpu.VMEM((n_pad, d_pad), jnp.float32)],
    )
    return pl.pallas_call(
        _dual_mlp_kernel,
        grid_spec=grid_spec,
        out_shape=(jax.ShapeDtypeStruct((2, n_pad, k_pad), jnp.float32),
                   jax.ShapeDtypeStruct((2, n_pad, d_pad), jnp.float32)),
        compiler_params=pltpu.CompilerParams(
            dimension_semantics=("parallel", "arbitrary"),
            vmem_limit_bytes=32 * 1024 * 1024),
    )(kf_counts, x_stack, we_stack, be_stack, wl_stack, bl_stack)


# ------------------------- Model (forward-pass port) -------------------------

class MultiscaledDistillationModelPallas:
    """JAX/Pallas port of MultiscaledDistillationModel.forward.

    The student/teacher submodules (not defined in the PyTorch source) are
    synthesized as identical-architecture patch MLPs returning (logits, embeddings).
    """

    def __init__(self, student_params, teacher_params, image_size, patch_size,
                 input_hw, in_channels, f_tile=256):
        # f_tile: contraction tile along F; raise to 1024-2048 for realistic image sizes.
        assert f_tile % 128 == 0
        self.image_size = image_size
        self.patch_size = patch_size
        H, W = input_hw
        C = in_channels
        P = patch_size
        self.input_hw = (H, W)
        self.in_channels = C
        self.f_tile = f_tile

        we_s, be_s, wl_s, bl_s = student_params
        we_t, be_t, wl_t, bl_t = teacher_params
        D = we_s.shape[1]
        K = wl_s.shape[1]
        self.embed_dim = D
        self.num_classes = K

        # ---- fold the (static) bilinear resize into the teacher's first linear ----
        # TODO(synk): torchvision transforms.Resize on tensors defaults to antialiased
        # bilinear; only plain bilinear (align_corners=False) is folded here.
        rh = _interp_matrix(P, H)                     # (P, H)
        rw = _interp_matrix(P, W)                     # (P, W)
        we_t_eff = jnp.einsum('ih,jw,cijd->chwd', rh, rw,
                              we_t.reshape(C, P, P, D)).reshape(C * H * W, D)

        in_dim_s = C * P * P
        in_dim_t = C * H * W
        self.in_dim_s = in_dim_s
        self.in_dim_t = in_dim_t

        # ---- per-branch F tile counts; shared storage pad is only for stacking ----
        kf_s = -(-in_dim_s // f_tile)
        kf_t = -(-in_dim_t // f_tile)
        kf_max = max(kf_s, kf_t)
        f_pad = kf_max * f_tile
        d_pad = max(128, _round_up(D, 128))
        k_pad = max(128, _round_up(K, 128))
        self.f_pad, self.d_pad, self.k_pad = f_pad, d_pad, k_pad
        self.kf_counts = jnp.array([kf_s, kf_t], dtype=jnp.int32)

        def pad2(a, rows, cols, dtype):
            a = a.astype(jnp.float32)
            return jnp.pad(a, ((0, rows - a.shape[0]),
                               (0, cols - a.shape[1]))).astype(dtype)

        # bf16 weight streams (dominant DMA term), f32 biases (tiny).
        # The student tail beyond kf_s tiles is never streamed (clamped index_map).
        self.we_stack = jnp.stack([pad2(we_s, f_pad, d_pad, jnp.bfloat16),
                                   pad2(we_t_eff, f_pad, d_pad, jnp.bfloat16)], axis=0)
        self.be_stack = jnp.stack([pad2(be_s, 1, d_pad, jnp.float32),
                                   pad2(be_t, 1, d_pad, jnp.float32)], axis=0)
        self.wl_stack = jnp.stack([pad2(wl_s, d_pad, k_pad, jnp.bfloat16),
                                   pad2(wl_t, d_pad, k_pad, jnp.bfloat16)], axis=0)
        self.bl_stack = jnp.stack([pad2(bl_s, 1, k_pad, jnp.float32),
                                   pad2(bl_t, 1, k_pad, jnp.float32)], axis=0)

    def prepare_img_tensor(self, img):
        # img: (B, C, H, W)
        _, _, h, w = img.shape
        p = self.patch_size
        crop_h = h - h % p
        crop_w = w - w % p
        # torchvision CenterCrop offsets
        top = int(round((h - crop_h) / 2.0))
        left = int(round((w - crop_w) / 2.0))
        img_new = img[:, :, top:top + crop_h, left:left + crop_w]
        return img_new, h // p, w // p

    def forward(self, x):
        batch_256, w_n, h_n = self.prepare_img_tensor(x)
        b, c, H, W = batch_256.shape
        p = self.patch_size

        # unfold(2,p,p).unfold(3,p,p) + rearrange 'b c p1 p2 w h -> (b p1 p2) c w h'
        patches = batch_256.reshape(b, c, H // p, p, W // p, p)
        patches = patches.transpose(0, 2, 4, 1, 3, 5).reshape(
            b * (H // p) * (W // p), c, p, p)
        num_patches = patches.shape[0]

        # PyTorch loop overwrites its outputs each iteration -> only the LAST
        # minibatch's outputs are consumed; compute only that slice.
        last_start = ((num_patches - 1) // p) * p
        mb = patches[last_start:last_start + p]
        n_s = mb.shape[0]
        mb_flat = mb.reshape(n_s, -1).astype(jnp.float32)      # (n_s, C*p*p)

        # Teacher: resize is folded into the weights; feed the raw flattened image.
        xt_flat = x.reshape(x.shape[0], -1).astype(jnp.float32)  # (B, C*Hraw*Wraw)
        n_t = xt_flat.shape[0]

        n_pad = max(8, _round_up(max(n_s, n_t), 8))
        xs_p = jnp.pad(mb_flat, ((0, n_pad - n_s), (0, self.f_pad - mb_flat.shape[1])))
        xt_p = jnp.pad(xt_flat, ((0, n_pad - n_t), (0, self.f_pad - xt_flat.shape[1])))
        x_stack = jnp.stack([xs_p, xt_p], axis=0)               # (2, n_pad, f_pad) f32

        logits_pad, emb_pad = fused_dual_mlp(
            self.kf_counts, x_stack, self.we_stack, self.be_stack,
            self.wl_stack, self.bl_stack, f_tile=self.f_tile)

        K, D = self.num_classes, self.embed_dim
        student_logits = logits_pad[0, :n_s, :K]
        student_embeddings = emb_pad[0, :n_s, :D]
        teacher_logits = logits_pad[1, :n_t, :K]
        teacher_embeddings = emb_pad[1, :n_t, :D]
        return student_logits, student_embeddings, teacher_logits, teacher_embeddings


# ------------------------------- Param init -------------------------------

def init_mlp_params(key, in_dim, embed_dim, num_classes):
    k1, k2, k3, k4 = jax.random.split(key, 4)
    we = jax.random.normal(k1, (in_dim, embed_dim), jnp.float32) * 0.02
    be = jax.random.normal(k2, (1, embed_dim), jnp.float32) * 0.02
    wl = jax.random.normal(k3, (embed_dim, num_classes), jnp.float32) * 0.02
    bl = jax.random.normal(k4, (1, num_classes), jnp.float32) * 0.02
    return (we, be, wl, bl)


# ------------------------- pure-JAX reference (for checking) -------------------------

def _ref_mlp(xf, we, be, wl, bl):
    h = jnp.maximum(xf @ we + be, 0.0)
    return h @ wl + bl, h


def _reference_forward(x, student_params, teacher_params, p):
    B, C, H, W = x.shape
    ch, cw = H - H % p, W - W % p
    top, left = int(round((H - ch) / 2.0)), int(round((W - cw) / 2.0))
    img = x[:, :, top:top + ch, left:left + cw]
    patches = img.reshape(B, C, ch // p, p, cw // p, p)
    patches = patches.transpose(0, 2, 4, 1, 3, 5).reshape(-1, C, p, p)
    n = patches.shape[0]
    last = ((n - 1) // p) * p
    mb = patches[last:last + p].reshape(-1, C * p * p)
    s_logits, s_emb = _ref_mlp(mb, *student_params)
    rh = _interp_matrix(p, H)
    rw = _interp_matrix(p, W)
    xt = jnp.einsum('ih,jw,bchw->bcij', rh, rw, x).reshape(B, -1)
    t_logits, t_emb = _ref_mlp(xt, *teacher_params)
    return s_logits, s_emb, t_logits, t_emb


# ---------------------------------- Main ----------------------------------

if __name__ == "__main__":
    key = jax.random.PRNGKey(0)
    kx, ks, kt = jax.random.split(key, 3)

    patch_size = 8
    B, C, H, W = 1, 3, 18, 18          # center crop -> 16x16 -> 4 patches of 8x8
    embed_dim = 32
    num_classes = 10

    x = jax.random.normal(kx, (B, C, H, W), jnp.float32)

    in_dim = C * patch_size * patch_size
    student_params = init_mlp_params(ks, in_dim, embed_dim, num_classes)
    teacher_params = init_mlp_params(kt, in_dim, embed_dim, num_classes)

    model = MultiscaledDistillationModelPallas(
        student_params, teacher_params,
        image_size=H, patch_size=patch_size,
        input_hw=(H, W), in_channels=C, f_tile=256)

    outs = model.forward(x)
    jax.block_until_ready(outs)

    s_logits, s_emb, t_logits, t_emb = outs
    assert s_logits.shape == (4, num_classes)
    assert s_emb.shape == (4, embed_dim)
    assert t_logits.shape == (1, num_classes)
    assert t_emb.shape == (1, embed_dim)

    # numerical check vs a pure-f32 JAX reference (plain bilinear, same semantics).
    # Tolerance covers the deliberate bf16 weight storage (perf review) + fold reorder.
    refs = _reference_forward(x, student_params, teacher_params, patch_size)
    for got, ref in zip(outs, refs):
        assert jnp.allclose(got, ref, atol=1e-2, rtol=1e-2), "mismatch vs reference"

    print("KERNEL_OK")
</pallas_src>

<mosaic_0001>
module attributes {stable_mosaic.version = 11 : i64} {
  func.func @_dual_mlp_kernel(%arg0: i32, %arg1: i32, %arg2: memref<2xi32, #tpu.memory_space<smem>>, %arg3: memref<1x8x256xf32, #tpu.memory_space<vmem>>, %arg4: memref<1x256x128xbf16, #tpu.memory_space<vmem>>, %arg5: memref<1x1x128xf32, #tpu.memory_space<vmem>>, %arg6: memref<1x128x128xbf16, #tpu.memory_space<vmem>>, %arg7: memref<1x1x128xf32, #tpu.memory_space<vmem>>, %arg8: memref<1x8x128xf32, #tpu.memory_space<vmem>>, %arg9: memref<1x8x128xf32, #tpu.memory_space<vmem>>, %arg10: memref<8x128xf32, #tpu.memory_space<vmem>>) attributes {dimension_semantics = [#tpu.dimension_semantics<parallel>, #tpu.dimension_semantics<arbitrary>], iteration_bounds = array<i64: 2, 4>, scalar_prefetch = 1 : i64, scratch_operands = 1 : i64, tpu.core_type = #tpu.core_type<tc>, window_params = [{transform_indices = @transform_0, window_bounds = array<i64: 1, 8, 256>}, {transform_indices = @transform_1, window_bounds = array<i64: 1, 256, 128>}, {transform_indices = @transform_2, window_bounds = array<i64: 1, 1, 128>}, {transform_indices = @transform_3, window_bounds = array<i64: 1, 128, 128>}, {transform_indices = @transform_4, window_bounds = array<i64: 1, 1, 128>}, {transform_indices = @transform_5, window_bounds = array<i64: 1, 8, 128>}, {transform_indices = @transform_6, window_bounds = array<i64: 1, 8, 128>}]} {
    %0 = arith.index_cast %arg0 : i32 to index
    %1 = memref.load %arg2[%0] : memref<2xi32, #tpu.memory_space<smem>>
    %c0_i32 = arith.constant 0 : i32
    %2 = arith.cmpi eq, %arg1, %c0_i32 : i32
    %3 = arith.extui %2 : i1 to i32
    %c0_i32_0 = arith.constant 0 : i32
    %4 = arith.cmpi ne, %3, %c0_i32_0 : i32
    scf.if %4 {
      %cst = arith.constant 0.000000e+00 : f32
      %12 = vector.broadcast %cst : f32 to vector<8x128xf32>
      %c0 = arith.constant 0 : index
      %c0_3 = arith.constant 0 : index
      %13 = vector.load %arg10[%c0, %c0_3] : memref<8x128xf32, #tpu.memory_space<vmem>>, vector<8x128xf32>
      tpu.vector_store %arg10[%c0, %c0_3], %12 {strides = array<i32>} : memref<8x128xf32, #tpu.memory_space<vmem>>, vector<8x128xf32>,
    } else {
    }
    %5 = arith.cmpi slt, %arg1, %1 : i32
    %6 = arith.extui %5 : i1 to i32
    %c0_i32_1 = arith.constant 0 : i32
    %7 = arith.cmpi ne, %6, %c0_i32_1 : i32
    scf.if %7 {
      %c0 = arith.constant 0 : index
      %c0_3 = arith.constant 0 : index
      %12 = vector.load %arg10[%c0, %c0_3] : memref<8x128xf32, #tpu.memory_space<vmem>>, vector<8x128xf32>
      %c0_4 = arith.constant 0 : index
      %c0_5 = arith.constant 0 : index
      %c0_6 = arith.constant 0 : index
      %13 = vector.load %arg3[%c0_4, %c0_5, %c0_6] : memref<1x8x256xf32, #tpu.memory_space<vmem>>, vector<1x8x256xf32>
      %14 = vector.shape_cast %13 : vector<1x8x256xf32> to vector<8x256xf32>
      %c0_7 = arith.constant 0 : index
      %c0_8 = arith.constant 0 : index
      %c0_9 = arith.constant 0 : index
      %15 = vector.load %arg4[%c0_7, %c0_8, %c0_9] : memref<1x256x128xbf16, #tpu.memory_space<vmem>>, vector<1x256x128xbf16>
      %16 = vector.shape_cast %15 : vector<1x256x128xbf16> to vector<256x128xbf16>
      %17 = arith.extf %16 : vector<256x128xbf16> to vector<256x128xf32>
      %cst = arith.constant dense<0.000000e+00> : vector<8x128xf32>
      %18 = tpu.matmul %14, %17, %cst {dimension_numbers = #tpu.dot_dimension_numbers<[1], [0], [0], [1], [0, 0, 1, 1], [], []>} : vector<8x256xf32>, vector<256x128xf32>, vector<8x128xf32> -> vector<8x128xf32>
      %19 = arith.addf %12, %18 : vector<8x128xf32>
      %c0_10 = arith.constant 0 : index
      %c0_11 = arith.constant 0 : index
      %20 = vector.load %arg10[%c0_10, %c0_11] : memref<8x128xf32, #tpu.memory_space<vmem>>, vector<8x128xf32>
      tpu.vector_store %arg10[%c0_10, %c0_11], %19 {strides = array<i32>} : memref<8x128xf32, #tpu.memory_space<vmem>>, vector<8x128xf32>,
    } else {
    }
    %c1_i32 = arith.constant 1 : i32
    %8 = arith.subi %1, %c1_i32 : i32
    %9 = arith.cmpi eq, %arg1, %8 : i32
    %10 = arith.extui %9 : i1 to i32
    %c0_i32_2 = arith.constant 0 : i32
    %11 = arith.cmpi ne, %10, %c0_i32_2 : i32
    scf.if %11 {
      %c0 = arith.constant 0 : index
      %c0_3 = arith.constant 0 : index
      %12 = vector.load %arg10[%c0, %c0_3] : memref<8x128xf32, #tpu.memory_space<vmem>>, vector<8x128xf32>
      %c0_4 = arith.constant 0 : index
      %c0_5 = arith.constant 0 : index
      %c0_6 = arith.constant 0 : index
      %13 = vector.load %arg5[%c0_4, %c0_5, %c0_6] : memref<1x1x128xf32, #tpu.memory_space<vmem>>, vector<1x1x128xf32>
      %14 = vector.shape_cast %13 : vector<1x1x128xf32> to vector<1x128xf32>
      %15 = vector.broadcast %14 : vector<1x128xf32> to vector<8x128xf32>
      %16 = arith.addf %12, %15 : vector<8x128xf32>
      %cst = arith.constant 0.000000e+00 : f32
      %17 = vector.broadcast %cst : f32 to vector<8x128xf32>
      %18 = arith.maximumf %16, %17 : vector<8x128xf32>
      %c0_7 = arith.constant 0 : index
      %c0_8 = arith.constant 0 : index
      %c0_9 = arith.constant 0 : index
      %19 = vector.load %arg9[%c0_7, %c0_8, %c0_9] : memref<1x8x128xf32, #tpu.memory_space<vmem>>, vector<1x8x128xf32>
      %20 = vector.shape_cast %19 : vector<1x8x128xf32> to vector<8x128xf32>
      %21 = vector.shape_cast %18 : vector<8x128xf32> to vector<1x8x128xf32>
      tpu.vector_store %arg9[%c0_7, %c0_8, %c0_9], %21 {strides = array<i32>} : memref<1x8x128xf32, #tpu.memory_space<vmem>>, vector<1x8x128xf32>,
      %c0_10 = arith.constant 0 : index
      %c0_11 = arith.constant 0 : index
      %c0_12 = arith.constant 0 : index
      %22 = vector.load %arg6[%c0_10, %c0_11, %c0_12] : memref<1x128x128xbf16, #tpu.memory_space<vmem>>, vector<1x128x128xbf16>
      %23 = vector.shape_cast %22 : vector<1x128x128xbf16> to vector<128x128xbf16>
      %24 = arith.extf %23 : vector<128x128xbf16> to vector<128x128xf32>
      %cst_13 = arith.constant dense<0.000000e+00> : vector<8x128xf32>
      %25 = tpu.matmul %18, %24, %cst_13 {dimension_numbers = #tpu.dot_dimension_numbers<[1], [0], [0], [1], [0, 0, 1, 1], [], []>} : vector<8x128xf32>, vector<128x128xf32>, vector<8x128xf32> -> vector<8x128xf32>
      %c0_14 = arith.constant 0 : index
      %c0_15 = arith.constant 0 : index
      %c0_16 = arith.constant 0 : index
      %26 = vector.load %arg7[%c0_14, %c0_15, %c0_16] : memref<1x1x128xf32, #tpu.memory_space<vmem>>, vector<1x1x128xf32>
      %27 = vector.shape_cast %26 : vector<1x1x128xf32> to vector<1x128xf32>
      %28 = vector.broadcast %27 : vector<1x128xf32> to vector<8x128xf32>
      %29 = arith.addf %25, %28 : vector<8x128xf32>
      %c0_17 = arith.constant 0 : index
      %c0_18 = arith.constant 0 : index
      %c0_19 = arith.constant 0 : index
      %30 = vector.load %arg8[%c0_17, %c0_18, %c0_19] : memref<1x8x128xf32, #tpu.memory_space<vmem>>, vector<1x8x128xf32>
      %31 = vector.shape_cast %30 : vector<1x8x128xf32> to vector<8x128xf32>
      %32 = vector.shape_cast %29 : vector<8x128xf32> to vector<1x8x128xf32>
      tpu.vector_store %arg8[%c0_17, %c0_18, %c0_19], %32 {strides = array<i32>} : memref<1x8x128xf32, #tpu.memory_space<vmem>>, vector<1x8x128xf32>,
    } else {
    }
    return
  }
  func.func @transform_0(%arg0: i32, %arg1: i32, %arg2: memref<2xi32, #tpu.memory_space<smem>>) -> (i32, i32, i32) {
    %0 = arith.index_cast %arg0 : i32 to index
    %1 = memref.load %arg2[%0] : memref<2xi32, #tpu.memory_space<smem>>
    %c1_i32 = arith.constant 1 : i32
    %2 = arith.subi %1, %c1_i32 : i32
    %3 = arith.minsi %arg1, %2 : i32
    %c0_i32 = arith.constant 0 : i32
    %c0_i32_0 = arith.constant 0 : i32
    return %arg0, %c0_i32, %3 : i32, i32, i32
  }
  func.func @transform_1(%arg0: i32, %arg1: i32, %arg2: memref<2xi32, #tpu.memory_space<smem>>) -> (i32, i32, i32) {
    %0 = arith.index_cast %arg0 : i32 to index
    %1 = memref.load %arg2[%0] : memref<2xi32, #tpu.memory_space<smem>>
    %c1_i32 = arith.constant 1 : i32
    %2 = arith.subi %1, %c1_i32 : i32
    %3 = arith.minsi %arg1, %2 : i32
    %c0_i32 = arith.constant 0 : i32
    %c0_i32_0 = arith.constant 0 : i32
    return %arg0, %3, %c0_i32 : i32, i32, i32
  }
  func.func @transform_2(%arg0: i32, %arg1: i32, %arg2: memref<2xi32, #tpu.memory_space<smem>>) -> (i32, i32, i32) {
    %c0_i32 = arith.constant 0 : i32
    %c0_i32_0 = arith.constant 0 : i32
    %c0_i32_1 = arith.constant 0 : i32
    return %arg0, %c0_i32, %c0_i32_0 : i32, i32, i32
  }
  func.func @transform_3(%arg0: i32, %arg1: i32, %arg2: memref<2xi32, #tpu.memory_space<smem>>) -> (i32, i32, i32) {
    %c0_i32 = arith.constant 0 : i32
    %c0_i32_0 = arith.constant 0 : i32
    %c0_i32_1 = arith.constant 0 : i32
    return %arg0, %c0_i32, %c0_i32_0 : i32, i32, i32
  }
  func.func @transform_4(%arg0: i32, %arg1: i32, %arg2: memref<2xi32, #tpu.memory_space<smem>>) -> (i32, i32, i32) {
    %c0_i32 = arith.constant 0 : i32
    %c0_i32_0 = arith.constant 0 : i32
    %c0_i32_1 = arith.constant 0 : i32
    return %arg0, %c0_i32, %c0_i32_0 : i32, i32, i32
  }
  func.func @transform_5(%arg0: i32, %arg1: i32, %arg2: memref<2xi32, #tpu.memory_space<smem>>) -> (i32, i32, i32) {
    %c0_i32 = arith.constant 0 : i32
    %c0_i32_0 = arith.constant 0 : i32
    %c0_i32_1 = arith.constant 0 : i32
    return %arg0, %c0_i32, %c0_i32_0 : i32, i32, i32
  }
  func.func @transform_6(%arg0: i32, %arg1: i32, %arg2: memref<2xi32, #tpu.memory_space<smem>>) -> (i32, i32, i32) {
    %c0_i32 = arith.constant 0 : i32
    %c0_i32_0 = arith.constant 0 : i32
    %c0_i32_1 = arith.constant 0 : i32
    return %arg0, %c0_i32, %c0_i32_0 : i32, i32, i32
  }
}

</mosaic_0001>

<bundles_post_ra>
// kernel: tpu_custom_call.1
= control target key start
LH: loop header
LB: loop body
LE: loop exit
PB: predicated region body
PF: predicated region fallthrough
CT: control target
= control target key end

     0   :  { %s2308_s0 = inlined_call_operand.hbm [shape: s32[2], index: 0, kind: input, shape index: {}]   ;;  %s2309_s1 = inlined_call_operand.hbm [shape: f32[2,8,1024], index: 1, kind: input, shape index: {}]   ;;  %s2310_s2 = inlined_call_operand.hbm [shape: bf16[2,1024,128], index: 2, kind: input, shape index: {}]   ;;  %s2311_s3 = inlined_call_operand.vmem [shape: f32[2,1,128], index: 3, kind: input, shape index: {}]   ;;  %s2312_s4 = inlined_call_operand.hbm [shape: bf16[2,128,128], index: 4, kind: input, shape index: {}]   ;;  %s2313_s5 = inlined_call_operand.vmem [shape: f32[2,1,128], index: 5, kind: input, shape index: {}]   ;;  %s2314_s6 = inlined_call_operand.hbm [shape: f32[2,8,128], index: 6, kind: output, shape index: {0}]   ;;  %s2315_s7 = inlined_call_operand.hbm [shape: f32[2,8,128], index: 7, kind: output, shape index: {1}]  }
   0x1   :  { %2335 = sst [smem:[#allocation34_spill]] %s2310_s2  ;;  %s1387_s26 = scalar_lea.hbm %s2308_s0, 16 }
   0x2   :  { %2336 = sst [smem:[#allocation35_spill]] %s2311_s3  ;;  %p1388_p0 = scmp.ne.s32.totalorder %s2308_s0, %s1387_s26 }
   0x3   :  { %2337 = sst [smem:[#allocation36_spill]] %s2312_s4  ;;  %p1391_p1 = scmp.lt.u32.totalorder %s1387_s26, %s2308_s0 }
   0x4   :  { %2338 = sst [smem:[#allocation37_spill]] %s2313_s5 }
   0x5   :  { %2339 = sst [smem:[#allocation38_spill]] %s2314_s6  ;;  %p1393_p2 = pnand %p1391_p1, %p1388_p0 }
   0x6   :  { %2340 = sst [smem:[#allocation39_spill]] %s2315_s7 }
   0x7   :  { %1396 = shalt.err (!%p1393_p2)  }
   0x8   :  { %s1677_s8 = smov [#allocation4]  }
   0x9   :  { %14 = dma.hbm_to_smem %s2308_s0, 16, %s1677_s8, [#allocation3] }
   0xa   :  { %1599 = dma.done.wait [#allocation3], 16 }
   0xb   :  { %1600 = vsyncadd [#allocation3], 4294967280 }
   0xc   :  { %16 = sfence }
   0xd   :  { %17 = vsyncpa [#allocation6], 0 }
   0xe   :  { %19 = vsyncpa [#allocation6 + $0x1], 0 }
   0xf   :  { %20 = vsyncpa [#allocation9], 0 }
  0x10   :  { %22 = vsyncpa [#allocation9 + $0x1], 0 }
  0x11   :  { %23 = vsyncpa [#allocation7], 0 }
  0x12   :  { %25 = vsyncpa [#allocation7 + $0x1], 0 }
  0x13   :  { %26 = vsyncpa [#allocation13], 0 }
  0x14   :  { %28 = vsyncpa [#allocation13 + $0x1], 0  ;;  %s1741_s11 = smov 0   ;;  %s1743_s12 = smov 0  }
  0x15   :  { %s1745_s13 = smov 0   ;;  %s1747_s14 = smov 0  }
  0x16   :  { %s1749_s0 = smov 0   ;;  %s1751_s15 = smov 0  }
  0x17   :  { %s1753_s16 = smov 0   ;;  %s1755_s17 = smov 0  }
  0x18   :  { %s1757_s18 = smov 0   ;;  %s1759_s19 = smov 0  }
  0x19   :  { %s1761_s20 = smov 0   ;;  %s1763_s21 = smov 0  }
  0x1a   :  { %s1765_s22 = smov 0   ;;  %s1767_s23 = smov 0  }
  0x1b LB: > { %2341 = sst [smem:[#allocation24_spill]] %s1643_s15  ;;  %s43_s24 = sadd.s32 1, %s1667_s21  ;;  %s1675_s23 = sphi %s1767_s23, %s34_s23   ;;  %s1671_s22 = sphi %s1765_s22, %s2419_s22   ;;  %s1667_s21 = sphi %s1763_s21, %s2408_s21   ;;  %s1663_s20 = sphi %s1761_s20, %s2418_s20   ;;  %s1659_s19 = sphi %s1759_s19, %s2407_s19   ;;  %s1655_s18 = sphi %s1757_s18, %s2417_s18   ;;  %s1651_s17 = sphi %s1755_s17, %s2416_s17   ;;  %s1647_s16 = sphi %s1753_s16, %s2415_s16   ;;  %s1643_s15 = sphi %s1751_s15, %s2405_s15   ;;  %s1639_s0 = sphi %s1749_s0, %s2414_s0   ;;  %s1635_s14 = sphi %s1747_s14, %s2413_s14   ;;  %s1631_s13 = sphi %s1745_s13, %s2412_s13   ;;  %s1627_s12 = sphi %s1743_s12, %s2411_s12   ;;  %s1623_s11 = sphi %s1741_s11, %s2410_s11  }
  0x1c   : > { %2342 = sst [smem:[#allocation25_spill]] %s1659_s19  ;;  %s46_s25 = sadd.s32 1, %s1671_s22 }
  0x1d   : > { %2343 = sst [smem:[#allocation26_spill]] %s1663_s20  ;;  %p44_p3 = scmp.ge.s32.totalorder %s43_s24, 4 }
  0x1e   : > { %2344 = sst [smem:[#allocation27_spill]] %s1667_s21  ;;  %p2324_p4 = scmp.eq.s32.totalorder %s1675_s23, 0 }
  0x1f   : > { %s86_s26 = sld [smem:[#allocation4 + %s1671_s22]]  ;;  %s2421_s24 = smov (%p44_p3, %s43_s24), 0 }
  0x20   : > { %2345 = sst [smem:[#allocation28_spill]] %s2421_s24  ;;  %s2423_s25 = smov (!%p44_p3, %s46_s25), %s1671_s22 }
  0x21   : > { %p106_p5 = scmp.ne.s32.totalorder %s1643_s15, %s1639_s0  ;;  %p48_p7 = scmp.ge.s32.totalorder %s2423_s25, 2 }
  0x22   : > { %p2325_p9 = scmp.lt.s32.totalorder %s1675_s23, 8  ;;  %s293_s27 = sand.u32 1, %s1643_s15  }
  0x23   : > { %p1825_p8 = por %p106_p5, %p2324_p4  ;;  %s2425_s25 = smov (%p48_p7, %s2423_s25), 0 }
  0x24   : > { %2347 = sst [smem:[#allocation29_spill]] %s2425_s25  ;;  %s1835_s8 = ssub.s32 %s1671_s22, %s2425_s25 }
  0x25   : > { %s934_s29 = sadd.s32 4294967295, %s86_s26  ;;  %s90_s9 = sld [smem:[#allocation4 + %s2425_s25]] }
  0x26   : > { %p88_p10 = scmp.lt.s32.totalorder %s1667_s21, %s934_s29  ;;  %s943_s6 = sshll.u32 %s293_s27, 7 }
  0x27   : > { %p1846_p11 = pnand %p2325_p9, %p1825_p8  ;;  %s295_s5 = scalar_lea.vmem [#allocation8], %s943_s6 }
  0x28   : > { %s89_s10 = scalar_select %p88_p10, %s1667_s21, %s934_s29 }
  0x29   : > { %s1234_s30 = scalar_select %p1825_p8, [#allocation4], [#allocation15] }
  0x2a   : > { %s308_s3 = sshll.u32 %s295_s5, 4  ;;  %p951_p0 = scmp.ge.s32.totalorder %s1675_s23, 1  ;;  %s1853_s3 = int_to_ptr.vmem [resolvable:$true] %s308_s3 }
  0x2b   : > { %s935_s19 = sadd.s32 4294967295, %s90_s9  ;;  %s2427_s30 = smov (!%p2325_p9, %s1234_s30), [#allocation17] }
  0x2c   : > { %p92_p12 = scmp.lt.s32.totalorder %s2421_s24, %s935_s19  ;;  %s2349_s5 = sadd.s32 1, %s1643_s15 }
  0x2d   : > { %s1235_s27 = scalar_select %p1825_p8, %s1671_s22, 0 }
  0x2e   : > { %s93_s29 = scalar_select %p92_p12, %s2421_s24, %s935_s19 }
  0x2f   : > { %s2429_s27 = smov (!%p2325_p9, %s1235_s27), 0  ;;  %p349_p1 = scmp.lt.s32.totalorder %s1675_s23, 9 }
  0x30   : > { %s95_s7 = ssub.s32 %s89_s10, %s93_s29  ;;  %s296_s19 = sld [smem:[%s2427_s30 + %s2429_s27]] }
  0x31   : > { %s96_s9 = sor.u32 %s95_s7, %s1835_s8  ;;  %p1871_p2 = pnand %p951_p0, %p349_p1 }
  0x32   : > { %p97_p13 = scmp.eq.s32.totalorder %s96_s9, 0  ;;  %s1877_s7 = sadd.s32 4294967295, %s1675_s23  }
  0x33   : > { %s2351_s28 = scalar_select %p1871_p2, 1, 0 }
  0x34   : > { %s1868_s6 = scalar_select %p97_p13, %s1643_s15, %s2349_s5  }
  0x35   : > { %2352 = sst [smem:[#allocation31_spill]] %s2351_s28  ;;  %p70_p5 = scmp.ne.s32.totalorder %s1655_s18, %s1651_s17 }
  0x36   : > { %2350 = sst [smem:[#allocation30_spill]] %s1868_s6  ;;  %s944_s10 = sadd.s32 4294967295, %s296_s19 }
  0x37   : > { %p298_p3 = scmp.lt.s32.totalorder %s1667_s21, %s944_s10  ;;  %s1880_s29 = sld [smem:[#allocation4 + %s1671_s22]] }
  0x38   : > { %s1883_s9 = sld [smem:[#allocation4 + %s2425_s25]]  ;;  %s2353_s6 = sshll.u32 %s1671_s22, 7 }
  0x39   : > { %s299_s5 = scalar_select %p298_p3, %s1667_s21, %s944_s10 }
  0x3a   : > { %p1895_p8 = por %p2324_p4, %p70_p5  ;;  %s2355_s2 = sld [smem:[#allocation34_spill]] }
  0x3b   : > { %s945_s27 = sshll.u32 %s299_s5, 5  ;;  %s2356_s5 = sand.u32 1, %s1675_s23  }
  0x3c   : > { %s305_s15 = sadd.s32 %s2353_s6, %s945_s27  ;;  %s1908_s30 = scalar_lea.sflag [#allocation9], %s2356_s5 }
  0x3d   : > { %s947_s20 = sshll.u32 %s305_s15, 6  ;;  %s932_s10 = sadd.s32 4294967295, %s1880_s29 }
  0x3e   : > { %p1399_p13 = pneg %p1846_p11 }
  0x40   : > { %s1903_s25 = scalar_lea.hbm %s2355_s2, %s947_s20  ;;  %s1402_s20 = scalar_lea.hbm %s2355_s2, 16384 }
  0x41   : > { %s1397_s6 = scalar_lea.hbm %s1903_s25, 2048  ;;  %p1403_p3 = scmp.lt.u32.totalorder %s1903_s25, %s2355_s2 }
  0x42   : > { %p1398_p12 = scmp.ne.s32.totalorder %s1903_s25, %s1397_s6  ;;  %p1404_p5 = scmp.lt.u32.totalorder %s1402_s20, %s1397_s6 }
  0x43   : > { %p1406_p9 = scmp.lt.u32.totalorder %s1397_s6, %s1903_s25 }
  0x44   : > { %p1400_p0 = pnand %p1399_p13, %p1398_p12  ;;  %p1405_p4 = por %p1404_p5, %p1403_p3 }
  0x46   : > { %p1401_p1 = pneg %p1400_p0  ;;  %p1407_p6 = por %p1406_p9, %p1405_p4 }
  0x48   : > { %p1408_p10 = pnand %p1407_p6, %p1401_p1 }
  0x4a   : > { %1411 = shalt.err (!%p1408_p10)
}
  0x4b   : > { %s1412_s5 = scalar_lea.vmem %s1853_s3, 2048  ;;  %s1678_s15 = smov [#allocation8]  }
  0x4c   : > { %p1413_p12 = scmp.ne.s32.totalorder %s1853_s3, %s1412_s5  ;;  %s1417_s4 = sshll.u32 %s1678_s15, 4  ;;  %s1418_s4 = int_to_ptr.vmem [resolvable:$false] %s1417_s4 }
  0x4d   : > { %s1419_s28 = scalar_lea.vmem %s1418_s4, 4096  ;;  %p1420_p2 = scmp.lt.s32.totalorder %s1853_s3, %s1418_s4 }
  0x4e   : > { %p1415_p0 = pnand %p1413_p12, %p1399_p13  ;;  %p1421_p3 = scmp.lt.s32.totalorder %s1419_s28, %s1412_s5 }
  0x50   : > { %p1416_p7 = pneg %p1415_p0  ;;  %p1422_p5 = por %p1421_p3, %p1420_p2 }
  0x52   : > { %p1423_p4 = pnand %p1422_p5, %p1416_p7 }
  0x54   : > { %1426 = shalt.err (!%p1423_p4)
}
  0x55   : > { %s2326_s6 = smov 64   ;;  %s2327_s20 = smov 4  }
  0x56   : > { %1255 = dma.hbm_to_vmem [thread:$0]  (!%p1846_p11), %s1903_s25, 2048, %s1853_s3, %s1908_s30, %s2326_s6, %s2326_s6, %s2327_s20  }
  0x57   : > { %p52_p6 = scmp.lt.s32.totalorder %s1667_s21, %s932_s10  ;;  %s933_s27 = sadd.s32 4294967295, %s1883_s9 }
  0x58   : > { %p56_p9 = scmp.lt.s32.totalorder %s2421_s24, %s933_s27  ;;  %p2357_p2 = scmp.ne.s32.totalorder %s1651_s17, %s1647_s16 }
  0x59   : > { %p2358_p7 = scmp.eq.s32.totalorder %s1877_s7, 0  ;;  %p2361_p11 = scmp.ne.s32.totalorder %s1639_s0, %s1635_s14 }
  0x5a   : > { %s53_s26 = scalar_select %p52_p6, %s1667_s21, %s932_s10 }
  0x5b   : > { %p1949_p10 = por %p2358_p7, %p2357_p2  ;;  %p2360_p13 = pmov %p2358_p7 }
  0x5c   : > { %s57_s15 = scalar_select %p56_p9, %s2421_s24, %s933_s27 }
  0x5d   : > { %s2359_s5 = scalar_select %p1949_p10, 1, 0 }
  0x5e   : > { %p1962_p1 = por %p2361_p11, %p2360_p13  ;;  %p214_p12 = scmp.eq.s32.totalorder %s1877_s7, 7 }
  0x5f   : > { %s59_s25 = ssub.s32 %s53_s26, %s57_s15  ;;  %s2328_s16 = sand.u32 1, %s1655_s18  }
  0x60   : > { %s2362_s3 = scalar_select %p1962_p1, 1, 0 }
  0x61   : > { %s60_s9 = sor.u32 %s59_s25, %s1835_s8  ;;  %s938_s29 = sshll.u32 %s2328_s16, 4 }
  0x62   : > { %p61_p0 = scmp.eq.s32.totalorder %s60_s9, 0  ;;  %s941_s10 = sshll.u32 %s1671_s22, 3 }
  0x63   : > { %s2363_s14 = sadd.s32 1, %s1655_s18  ;;  %p2365_p3 = scmp.lt.s32.totalorder %s1675_s23, 8 }
  0x64   : > { %s1975_s4 = scalar_select %p61_p0, %s1655_s18, %s2363_s14  }
  0x65   : > { %s1231_s28 = scalar_select %p1895_p8, [#allocation4], [#allocation14] }
  0x66   : > { %2364 = sst [smem:[#allocation32_spill]] %s1975_s4  ;;  %p2366_p5 = pmov %p2365_p3 }
  0x67   : > { %s1232_s27 = scalar_select %p1895_p8, %s1671_s22, 0 }
  0x68   : > { %s2431_s28 = smov (!%p2365_p3, %s1231_s28), [#allocation16]  ;;  %s270_s26 = scalar_lea.vmem [#allocation5], %s938_s29 }
  0x69   : > { %s2433_s27 = smov (!%p2366_p5, %s1232_s27), 0  ;;  %s284_s15 = sshll.u32 %s270_s26, 4  ;;  %s1994_s15 = int_to_ptr.vmem [resolvable:$true] %s284_s15 }
  0x6a   : > { %p2367_p4 = pmov %p2365_p3  ;;  %s271_s9 = sld [smem:[%s2431_s28 + %s2433_s27]] }
  0x6b   : > { %s931_s14 = sadd.s32 4294967294, %s1675_s23   ;;  %p149_p9 = scmp.eq.s32.totalorder %s1835_s8, 0 }
  0x6c   : > { %p1990_p6 = pnand %p2367_p4, %p1895_p8  ;;  %s151_s6 = sadd.s32 1, %s1631_s13 }
  0x6d   : > { %p158_p2 = scmp.ne.s32.totalorder %s1631_s13, %s1627_s12  ;;  %p164_p13 = scmp.ne.s32.totalorder %s1627_s12, %s1623_s11 }
  0x6e   : > { %s2005_s19 = scalar_select %p149_p9, %s1631_s13, %s151_s6  }
  0x6f   : > { %p2370_p8 = scmp.eq.s32.totalorder %s1675_s23, 0  ;;  %p2372_p0 = scmp.eq.s32.totalorder %s1877_s7, 0 }
  0x70   : > { %s939_s20 = sadd.s32 4294967295, %s271_s9  ;;  %2369 = sst [smem:[#allocation33_spill]] %s2005_s19 }
  0x71   : > { %p273_p7 = scmp.lt.s32.totalorder %s1667_s21, %s939_s20  ;;  %p2010_p11 = por %p158_p2, %p2370_p8 }
  0x72   : > { %p2016_p3 = por %p164_p13, %p2372_p0  ;;  %p2022_p5 = por %p214_p12, %p158_p2 }
  0x73   : > { %s274_s29 = scalar_select %p273_p7, %s1667_s21, %s939_s20 }
  0x74   : > { %s2373_s28 = scalar_select %p2016_p3, 1, 0 }
  0x75   : > { %s940_s8 = sshll.u32 %s274_s29, 1  ;;  %p220_p4 = scmp.eq.s32.totalorder %s931_s14, 7 }
  0x76   : > { %s2374_s27 = scalar_select %p2022_p5, 1, 0 }
  0x77   : > { %s280_s6 = sadd.s32 %s941_s10, %s940_s8  ;;  %s326_s20 = sand.u32 1, %s1631_s13  }
  0x78   : > { %s942_s9 = sshll.u32 %s280_s6, 7  ;;  %p2032_p9 = por %p220_p4, %p164_p13 }
  0x79   : > { %s2030_s24 = scalar_lea.hbm %s2309_s1, %s942_s9  ;;  %s2376_s21 = sand.u32 1, %s1655_s18  }
  0x7a   : > { %s2375_s29 = scalar_select %p2032_p9, 1, 0 }
  0x7b   : > { %s267_s4 = scalar_lea.sflag [#allocation6], %s2376_s21  ;;  %s1427_s19 = scalar_lea.hbm %s2030_s24, 256 }
  0x7c   : > { %p1428_p12 = scmp.ne.s32.totalorder %s2030_s24, %s1427_s19  ;;  %p1429_p2 = pneg %p1990_p6 }
  0x7d   : > { %s1432_s10 = scalar_lea.hbm %s2309_s1, 2048  ;;  %p1433_p13 = scmp.lt.u32.totalorder %s2030_s24, %s2309_s1 }
  0x7e   : > { %p1430_p7 = pnand %p1429_p2, %p1428_p12  ;;  %p1434_p0 = scmp.lt.u32.totalorder %s1432_s10, %s1427_s19 }
  0x7f   : > { %p1436_p9 = scmp.lt.u32.totalorder %s1427_s19, %s2030_s24 }
  0x80   : > { %p1431_p8 = pneg %p1430_p7  ;;  %p1435_p4 = por %p1434_p0, %p1433_p13 }
  0x82   : > { %p1437_p5 = por %p1436_p9, %p1435_p4 }
  0x84   : > { %p1438_p3 = pnand %p1437_p5, %p1431_p8 }
  0x86   : > { %1441 = shalt.err (!%p1438_p3)
}
  0x87   : > { %s1442_s21 = scalar_lea.vmem %s1994_s15, 256  ;;  %s1681_s6 = smov [#allocation5]  }
  0x88   : > { %p1443_p12 = scmp.ne.s32.totalorder %s1994_s15, %s1442_s21  ;;  %s1447_s9 = sshll.u32 %s1681_s6, 4  ;;  %s1448_s9 = int_to_ptr.vmem [resolvable:$false] %s1447_s9 }
  0x89   : > { %s1449_s2 = scalar_lea.vmem %s1448_s9, 512  ;;  %p1450_p10 = scmp.lt.s32.totalorder %s1994_s15, %s1448_s9 }
  0x8a   : > { %p1445_p7 = pnand %p1443_p12, %p1429_p2  ;;  %p1451_p13 = scmp.lt.s32.totalorder %s1449_s2, %s1442_s21 }
  0x8c   : > { %p1446_p1 = pneg %p1445_p7  ;;  %p1452_p0 = por %p1451_p13, %p1450_p10 }
  0x8e   : > { %p1453_p9 = pnand %p1452_p0, %p1446_p1 }
  0x90   : > { %1456 = shalt.err (!%p1453_p9)
}
  0x91   : > { %1250 = dma.hbm_to_vmem [thread:$0]  (!%p1990_p6), %s2030_s24, 256, %s1994_s15, %s267_s4  }
  0x92   : > { %s948_s19 = sshll.u32 %s326_s20, 6  ;;  %s969_s16 = sshll.u32 %s1671_s22, 10 }
  0x93   : > { %s2377_s8 = sld [smem:[#allocation36_spill]]  ;;  %s328_s25 = scalar_lea.vmem [#allocation10], %s948_s19 }
  0x94   : > { %s335_s21 = sshll.u32 %s328_s25, 4  ;;  %p2378_p10 = scmp.lt.s32.totalorder %s1675_s23, 8  ;;  %s2079_s21 = int_to_ptr.vmem [resolvable:$true] %s335_s21 }
  0x96   : > { %p2075_p1 = pnand %p2378_p10, %p2010_p11 }
  0x98   : > { %p1459_p3 = pneg %p2075_p1 }
  0x99   : > { %s2069_s6 = scalar_lea.hbm %s2377_s8, %s969_s16  ;;  %s1462_s26 = scalar_lea.hbm %s2377_s8, 2048 }
  0x9a   : > { %s1457_s24 = scalar_lea.hbm %s2069_s6, 1024  ;;  %p1463_p11 = scmp.lt.u32.totalorder %s2069_s6, %s2377_s8 }
  0x9b   : > { %p1458_p6 = scmp.ne.s32.totalorder %s2069_s6, %s1457_s24  ;;  %p1464_p8 = scmp.lt.u32.totalorder %s1462_s26, %s1457_s24 }
  0x9c   : > { %p1466_p12 = scmp.lt.u32.totalorder %s1457_s24, %s2069_s6 }
  0x9d   : > { %p1460_p5 = pnand %p1459_p3, %p1458_p6  ;;  %p1465_p4 = por %p1464_p8, %p1463_p11 }
  0x9f   : > { %p1461_p2 = pneg %p1460_p5  ;;  %p1467_p7 = por %p1466_p12, %p1465_p4 }
  0xa1   : > { %p1468_p13 = pnand %p1467_p7, %p1461_p2 }
  0xa3   : > { %1471 = shalt.err (!%p1468_p13)
}
  0xa4   : > { %s1472_s19 = scalar_lea.vmem %s2079_s21, 1024  ;;  %s1682_s16 = smov [#allocation10]  }
  0xa5   : > { %p1473_p0 = scmp.ne.s32.totalorder %s2079_s21, %s1472_s19  ;;  %s1477_s10 = sshll.u32 %s1682_s16, 4  ;;  %s1478_s10 = int_to_ptr.vmem [resolvable:$false] %s1477_s10 }
  0xa6   : > { %s1479_s14 = scalar_lea.vmem %s1478_s10, 2048  ;;  %p1480_p6 = scmp.lt.s32.totalorder %s2079_s21, %s1478_s10 }
  0xa7   : > { %p1475_p9 = pnand %p1473_p0, %p1459_p3  ;;  %p1481_p5 = scmp.lt.s32.totalorder %s1479_s14, %s1472_s19 }
  0xa9   : > { %p1476_p10 = pneg %p1475_p9  ;;  %p1482_p11 = por %p1481_p5, %p1480_p6 }
  0xab   : > { %p1483_p8 = pnand %p1482_p11, %p1476_p10 }
  0xad   : > { %1486 = shalt.err (!%p1483_p8)
}
  0xae   : > { %s2380_s25 = smov 4   ;;  %s2381_s24 = smov 64  }
  0xaf   : > { %1258 = dma.hbm_to_vmem [thread:$0]  (!%p2075_p1), %s2069_s6, 1024, %s2079_s21, %s1908_s30, %s2381_s24, %s2381_s24, %s2380_s25  }
  0xb0   : > { %s2382_s4 = sld [smem:[#allocation31_spill]] }
  0xb6   : > { %p2383_p3 = scmp.ne.s32.totalorder %s2382_s4, 0 }
  0xb7   : > { %s355_s15 = sand.u32 (!%p2383_p3), 1, %s1651_s17   ;;  %p2384_p2 = scmp.ne.s32.totalorder (!%p2383_p3), %s2359_s5, 0 }
  0xb8   : > { %353 = sbr.rel (%p2383_p3) target bundleno = 784 (0x310), region = 40  ;;  %s2113_s26 = sshll.u32 (!%p2383_p3), %s355_s15, 4 }
  0xb9   : > { %s356_s20 = scalar_lea.sflag (!%p2383_p3), [#allocation6], %s355_s15 }
  0xbf   : > { %1602 = dma.done.wait (%p2384_p2), %s356_s20, 256  }
  0xc0   : > { %1604 = vsyncadd (%p2384_p2), %s356_s20, 4294967040  ;;  %s364_s30 = sand.u32 1, %s1877_s7   ;;  %s366_s6 = sand.u32 1, %s1639_s0  }
  0xc1   : > { %s953_s21 = sshll.u32 %s366_s6, 7  ;;  %s365_s9 = scalar_lea.sflag [#allocation9], %s364_s30 }
  0xc2   : > { %s2122_s19 = scalar_lea.vmem [#allocation8], %s953_s21  ;;  %p2385_p1 = scmp.ne.s32.totalorder %s2362_s3, 0 }
  0xc4   : > { %1606 = dma.done.wait (%p2385_p1), %s365_s9, 2048  }
  0xc5   : > { %1608 = vsyncadd (%p2385_p1), %s365_s9, 4294965248  ;;  %s2129_s16 = sand.u32 1, %s1627_s12   ;;  %p2386_p4 = scmp.ne.s32.totalorder %s2373_s28, 0 }
  0xc6   : > { %s954_s5 = sshll.u32 %s2129_s16, 6 }
  0xc7   : > { %s2132_s10 = scalar_lea.vmem [#allocation10], %s954_s5 }
  0xc8   : > { %1610 = dma.done.wait (%p2386_p4), %s365_s9, 1024  }
  0xc9   : > { %1612 = vsyncadd (%p2386_p4), %s365_s9, 4294966272  ;;  %s2387_s7 = sld [smem:[#allocation26_spill]]  ;;  %s955_s14 = sshll.u32 %s2129_s16, 3 }
  0xca   : > { %s2388_s4 = sld [smem:[#allocation35_spill]]  ;;  %s2389_s28 = sld [smem:[#allocation37_spill]] }
  0xcb   : > { %s2154_s21 = scalar_lea.vmem [#allocation11], %s955_s14  ;;  %s2156_s9 = scalar_lea.vmem [#allocation12], %s955_s14 }
  0xcc   : > { %s2390_s5 = sld [smem:[#allocation25_spill]] }
  0xcf   : > { %p437_p12 = scmp.lt.s32.totalorder %s2387_s7, 1  ;;  %s2141_s3 = sld [smem:[#allocation4 + %s2387_s7]] }
  0xd1   : > { %s2435_s7 = smov (!%p437_p12, %s2387_s7), 1 }
  0xd2   : > { %s439_s15 = scalar_lea.vmem %s2388_s4, %s2435_s7  ;;  %s442_s6 = scalar_lea.vmem %s2389_s28, %s2435_s7 }
  0xd3   : > { %p957_p7 = scmp.ne.s32.totalorder %s2390_s5, 0 }
  0xd4   : > { %v1683_v0 = vmov (!%p957_p7), 0.0  }
  0xd5   : > { %447 = sbr.rel (%p957_p7) target bundleno = 220 (0xdc), region = 56  ;;  %448 = vst [vmem:[#allocation2] sm:$0xff] (!%p957_p7), %v1683_v0 }
  0xdc PF: > { %s2391_s2 = sld [smem:[#allocation25_spill]] }
  0xe2   : > { %p958_p13 = scmp.ge.s32.totalorder %s2391_s2, %s2141_s3 }
  0xe3   : > { %v1073_v1 = vld [vmem:[%s2122_s19 + $0x40] sm:$0xff] (!%p958_p13)   ;;  %v1074_v3 = vld [vmem:[%s2122_s19 + $0x48] sm:$0xff] (!%p958_p13)   ;;  %v1075_v5 = vld [vmem:[%s2122_s19 + $0x50] sm:$0xff] (!%p958_p13)   ;;  %s2392_s2 = scalar_lea.vmem (!%p958_p13), [#allocation5], %s2113_s26 }
  0xe4   : > { %452 = sbr.rel (%p958_p13) target bundleno = 478 (0x1de), region = 60  ;;  %v971_v2 = vld [vmem:[%s2122_s19] sm:$0xff] (!%p958_p13)   ;;  %1176 = vmatprep.subr.bf16.mxu0 (!%p958_p13), %v1073_v1  ;;  %v1066_v4 = vld [vmem:[%s2122_s19 + $0x8] sm:$0xff] (!%p958_p13)   ;;  %v1067_v7 = vld [vmem:[%s2122_s19 + $0x10] sm:$0xff] (!%p958_p13)   ;;  %s2393_s14 = smov (!%p958_p13), %s2392_s2 }
  0xe5   : > { %1178 = vmatpush3.bf16.msra.mxu0 (!%p958_p13), %v971_v2  ;;  %v455_v6 = vld [vmem:[%s2392_s2 + $0x8] sm:$0xff] (!%p958_p13)  ;;  %v1077_v10 = vld [vmem:[%s2122_s19 + $0x60] sm:$0xff] (!%p958_p13)   ;;  %v1079_v14 = vld [vmem:[%s2122_s19 + $0x70] sm:$0xff] (!%p958_p13)  }
  0xe6   : > { %1180 = vmatprep.subr.bf16.mxu0 (!%p958_p13), %v1074_v3  ;;  %584 = vmatprep.mubr.f32.mxu0 (!%p958_p13), %v455_v6  ;;  %v1076_v8 = vld [vmem:[%s2122_s19 + $0x58] sm:$0xff] (!%p958_p13)   ;;  %v1069_v11 = vld [vmem:[%s2122_s19 + $0x20] sm:$0xff] (!%p958_p13)   ;;  %v1078_v12 = vld [vmem:[%s2122_s19 + $0x68] sm:$0xff] (!%p958_p13)  }
  0xe7   : > { %v1068_v9 = vld [vmem:[%s2122_s19 + $0x18] sm:$0xff] (!%p958_p13)   ;;  %v1070_v13 = vld [vmem:[%s2122_s19 + $0x28] sm:$0xff] (!%p958_p13)   ;;  %v1071_v15 = vld [vmem:[%s2122_s19 + $0x30] sm:$0xff] (!%p958_p13)  }
  0xe8   : > { %v1080_v16 = vld [vmem:[%s2122_s19 + $0x78] sm:$0xff] (!%p958_p13)   ;;  %v454_v18 = vld [vmem:[%s2393_s14] sm:$0xff] (!%p958_p13) }
  0xe9   : > { %1182 = vmatpush3.bf16.msra.mxu0 (!%p958_p13), %v1066_v4  ;;  %v1072_v17 = vld [vmem:[%s2122_s19 + $0x38] sm:$0xff] (!%p958_p13)  }
  0xea   : > { %1184 = vmatprep.subr.bf16.mxu0 (!%p958_p13), %v1075_v5  ;;  %v453_v20 = vld [vmem:[#allocation2] sm:$0xff] (!%p958_p13) }
  0xed   : > { %1186 = vmatpush3.bf16.msra.mxu0 %v1067_v7 }
  0xee   : > { %1188 = vmatprep.subr.bf16.mxu0 %v1076_v8 }
  0xf1   : > { %1190 = vmatpush3.bf16.msra.mxu0 %v1068_v9 }
  0xf2   : > { %1192 = vmatprep.subr.bf16.mxu0 %v1077_v10 }
  0xf5   : > { %1194 = vmatpush3.bf16.msra.mxu0 %v1069_v11 }
  0xf6   : > { %1196 = vmatprep.subr.bf16.mxu0 %v1078_v12 }
  0xf9   : > { %1198 = vmatpush3.bf16.msra.mxu0 %v1070_v13 }
  0xfa   : > { %1200 = vmatprep.subr.bf16.mxu0 %v1079_v14 }
  0xfd   : > { %1202 = vmatpush3.bf16.msra.mxu0 %v1071_v15 }
  0xfe   : > { %1204 = vmatprep.subr.bf16.mxu0 %v1080_v16 }
 0x101   : > { %1206 = vmatpush3.bf16.msra.mxu0 %v1072_v17 }
 0x104   : > { %585 = vmatmul.mubr.f32.vlgmr.msra.gmra.mrb[0].mxu0 %v454_v18 }
 0x1d7   : > { %v1120_v19 = vpop.f32.mrb[0].mxu0 }
 0x1d8   : > { %v1121_v21 = vpop.f32.mrb[1].mxu0 }
 0x1d9   : > { %v1122_v22 = vadd.f32 %v1121_v21, %v1120_v19 }
 0x1db   : > { %v590_v23 = vadd.f32 %v1122_v22, %v453_v20 }
 0x1dd   : > { %591 = vst [vmem:[#allocation2] sm:$0xff] %v590_v23 }
 0x1de PF: > { %s959_s25 = sadd.s32 4294967295, %s2141_s3  ;;  %s2394_s24 = sld [smem:[#allocation25_spill]] }
 0x1e4   : > { %p960_p0 = scmp.ne.s32.totalorder %s2394_s24, %s959_s25 }
 0x1e5   : > { %v1035_v24 = vld [vmem:[%s2132_s10] sm:$0xff] (!%p960_p0)   ;;  %v1684_v25 = vmov (!%p960_p0), 0.0|0.0   ;;  %vm1685_vm0 = vmmov (!%p960_p0), 0   ;;  %v1686_v26 = vmov (!%p960_p0), 0.0   ;;  %v597_v27 = vld [vmem:[#allocation2] sm:$0xff] (!%p960_p0)  ;;  %v1081_v28 = vld [vmem:[%s2132_s10 + $0x8] sm:$0xff] (!%p960_p0)  }
 0x1e6   : > { %596 = sbr.rel (%p960_p0) target bundleno = 733 (0x2dd), region = 64  ;;  %1207 = vmatprep.subr.bf16.mxu0 (!%p960_p0), %v1684_v25  ;;  %1172 = vmatprep.mubr.msk.f32.mxu0 (!%p960_p0), %vm1685_vm0, %v1686_v26  ;;  %v961_v29 = vld [vmem:[%s439_s15] ss:$0 sm:$0xff] (!%p960_p0)  ;;  %v1082_v32 = vld [vmem:[%s2132_s10 + $0x10] sm:$0xff] (!%p960_p0)   ;;  %v1083_v33 = vld [vmem:[%s2132_s10 + $0x18] sm:$0xff] (!%p960_p0)  }
 0x1e7   : > { %1209 = vmatpush3.bf16.msra.mxu0 (!%p960_p0), %v1035_v24  ;;  %v605_v30 = vadd.f32 (!%p960_p0), %v961_v29, %v597_v27  ;;  %v1084_v34 = vld [vmem:[%s2132_s10 + $0x20] sm:$0xff] (!%p960_p0)   ;;  %v1085_v35 = vld [vmem:[%s2132_s10 + $0x28] sm:$0xff] (!%p960_p0)   ;;  %v1086_v36 = vld [vmem:[%s2132_s10 + $0x30] sm:$0xff] (!%p960_p0)  }
 0x1e8   : > { %1210 = vmatprep.subr.bf16.mxu0 (!%p960_p0), %v1684_v25  ;;  %v1087_v37 = vld [vmem:[%s2132_s10 + $0x38] sm:$0xff] (!%p960_p0)   ;;  %v962_v38 = vld [vmem:[%s442_s6] ss:$0 sm:$0xff] (!%p960_p0) }
 0x1e9   : > { %v606_v31 = vmax.f32 (!%p960_p0), %v605_v30, 0.0 }
 0x1eb   : > { %1212 = vmatpush3.bf16.msra.mxu0 (!%p960_p0), %v1081_v28  ;;  %607 = vst [vmem:[%s2156_s9] sm:$0xff] (!%p960_p0), %v606_v31 }
 0x1ec   : > { %1213 = vmatprep.subr.bf16.mxu0 (!%p960_p0), %v1684_v25 }
 0x1ef   : > { %1215 = vmatpush3.bf16.msra.mxu0 %v1082_v32 }
 0x1f0   : > { %1216 = vmatprep.subr.bf16.mxu0 %v1684_v25 }
 0x1f3   : > { %1218 = vmatpush3.bf16.msra.mxu0 %v1083_v33 }
 0x1f4   : > { %1219 = vmatprep.subr.bf16.mxu0 %v1684_v25 }
 0x1f7   : > { %1221 = vmatpush3.bf16.msra.mxu0 %v1084_v34 }
 0x1f8   : > { %1222 = vmatprep.subr.bf16.mxu0 %v1684_v25 }
 0x1fb   : > { %1224 = vmatpush3.bf16.msra.mxu0 %v1085_v35 }
 0x1fc   : > { %1225 = vmatprep.subr.bf16.mxu0 %v1684_v25 }
 0x1ff   : > { %1227 = vmatpush3.bf16.msra.mxu0 %v1086_v36 }
 0x200   : > { %1228 = vmatprep.subr.bf16.mxu0 %v1684_v25 }
 0x203   : > { %1230 = vmatpush3.bf16.msra.mxu0 %v1087_v37 }
 0x206   : > { %1173 = vmatmul.mubr.f32.vlgmr.msra.gmra.mrb[0].mxu0 %v606_v31 }
 0x2d9   : > { %v713_v39 = vpop.f32.mrb[0].mxu0 }
 0x2da   : > { %v714_v40 = vadd.f32 %v962_v38, %v713_v39  ;;  %v1174_v41 = vpop.f32.mrb[1].mxu0 }
 0x2dc   : > { %717 = vst [vmem:[%s2154_s21] sm:$0xff] %v714_v40 }
 0x2dd PF: > { %s2397_s30 = sld [smem:[#allocation26_spill]]  ;;  %s2398_s2 = sld [smem:[#allocation38_spill]] }
 0x2de   : > { %s737_s25 = sshll.u32 %s2154_s21, 4  ;;  %s719_s7 = scalar_lea.sflag [#allocation7], %s2129_s16  ;;  %s738_s25 = int_to_ptr.vmem [resolvable:$true] %s737_s25 }
 0x2df   : > { %s1487_s6 = scalar_lea.vmem %s738_s25, 128  ;;  %p2399_p10 = scmp.ne.s32.totalorder %s2374_s27, 0 }
 0x2e0   : > { %p1488_p9 = scmp.ne.s32.totalorder %s738_s25, %s1487_s6  ;;  %s1687_s24 = smov [#allocation11]  }
 0x2e1   : > { %s1491_s26 = sshll.u32 %s1687_s24, 4  ;;  %s1492_s26 = int_to_ptr.vmem [resolvable:$false] %s1491_s26 }
 0x2e2   : > { %p1489_p6 = pnand %p1488_p9, %p2399_p10  ;;  %s1493_s19 = scalar_lea.vmem %s1492_s26, 256 }
 0x2e3   : > { %s965_s28 = sshll.u32 %s2397_s30, 7  ;;  %p1494_p11 = scmp.lt.s32.totalorder %s738_s25, %s1492_s26 }
 0x2e4   : > { %s2209_s14 = scalar_lea.hbm %s2398_s2, %s965_s28  ;;  %p1490_p5 = pneg %p1489_p6 }
 0x2e5   : > { %p1495_p8 = scmp.lt.s32.totalorder %s1493_s19, %s1487_s6 }
 0x2e7   : > { %p1496_p3 = por %p1495_p8, %p1494_p11 }
 0x2e9   : > { %p1497_p2 = pnand %p1496_p3, %p1490_p5 }
 0x2eb   : > { %1500 = shalt.err (!%p1497_p2)
}
 0x2ec   : > { %s1501_s21 = scalar_lea.hbm %s2209_s14, 128  ;;  %s1505_s15 = scalar_lea.hbm %s2398_s2, 256 }
 0x2ed   : > { %p1502_p1 = scmp.ne.s32.totalorder %s2209_s14, %s1501_s21  ;;  %p1506_p7 = scmp.lt.u32.totalorder %s2209_s14, %s2398_s2 }
 0x2ee   : > { %p1507_p13 = scmp.lt.u32.totalorder %s1505_s15, %s1501_s21  ;;  %p1509_p9 = scmp.lt.u32.totalorder %s1501_s21, %s2209_s14 }
 0x2ef   : > { %p1503_p4 = pnand %p1502_p1, %p2399_p10 }
 0x2f0   : > { %p1508_p0 = por %p1507_p13, %p1506_p7 }
 0x2f1   : > { %p1504_p12 = pneg %p1503_p4 }
 0x2f2   : > { %p1510_p6 = por %p1509_p9, %p1508_p0 }
 0x2f4   : > { %p1511_p5 = pnand %p1510_p6, %p1504_p12 }
 0x2f6   : > { %1514 = shalt.err (!%p1511_p5)
}
 0x2f7   : > { %1241 = dma.vmem_to_hbm [thread:$0]  (%p2399_p10), %s738_s25, 128, %s2209_s14, %s719_s7  }
 0x2f8   : > { %s2400_s24 = sld [smem:[#allocation39_spill]]  ;;  %s750_s19 = sshll.u32 %s2156_s9, 4  ;;  %s751_s19 = int_to_ptr.vmem [resolvable:$true] %s750_s19 }
 0x2f9   : > { %s724_s21 = scalar_lea.sflag [#allocation13], %s2129_s16  ;;  %s1515_s3 = scalar_lea.vmem %s751_s19, 128 }
 0x2fa   : > { %p1516_p11 = scmp.ne.s32.totalorder %s751_s19, %s1515_s3  ;;  %s1688_s4 = smov [#allocation12]  }
 0x2fb   : > { %s1519_s15 = sshll.u32 %s1688_s4, 4  ;;  %s1520_s15 = int_to_ptr.vmem [resolvable:$false] %s1519_s15 }
 0x2fc   : > { %p1517_p8 = pnand %p1516_p11, %p2399_p10  ;;  %s1521_s20 = scalar_lea.vmem %s1520_s15, 256 }
 0x2fd   : > { %p1522_p2 = scmp.lt.s32.totalorder %s751_s19, %s1520_s15  ;;  %p1523_p1 = scmp.lt.s32.totalorder %s1521_s20, %s1515_s3 }
 0x2fe   : > { %s2235_s26 = scalar_lea.hbm %s2400_s24, %s965_s28  ;;  %p1518_p3 = pneg %p1517_p8 }
 0x2ff   : > { %p1524_p4 = por %p1523_p1, %p1522_p2 }
 0x301   : > { %p1525_p12 = pnand %p1524_p4, %p1518_p3 }
 0x303   : > { %1528 = shalt.err (!%p1525_p12)
}
 0x304   : > { %s1529_s16 = scalar_lea.hbm %s2235_s26, 128  ;;  %s1533_s28 = scalar_lea.hbm %s2400_s24, 256 }
 0x305   : > { %p1530_p7 = scmp.ne.s32.totalorder %s2235_s26, %s1529_s16  ;;  %p1534_p9 = scmp.lt.u32.totalorder %s2235_s26, %s2400_s24 }
 0x306   : > { %p1535_p6 = scmp.lt.u32.totalorder %s1533_s28, %s1529_s16  ;;  %p1537_p11 = scmp.lt.u32.totalorder %s1529_s16, %s2235_s26 }
 0x307   : > { %p1531_p13 = pnand %p1530_p7, %p2399_p10 }
 0x308   : > { %p1536_p5 = por %p1535_p6, %p1534_p9 }
 0x309   : > { %p1532_p0 = pneg %p1531_p13 }
 0x30a   : > { %p1538_p8 = por %p1537_p11, %p1536_p5 }
 0x30c   : > { %p1539_p3 = pnand %p1538_p8, %p1532_p0 }
 0x30e   : > { %1542 = shalt.err (!%p1539_p3)
}
 0x30f   : > { %1242 = dma.vmem_to_hbm [thread:$0]  (%p2399_p10), %s751_s19, 128, %s2235_s26, %s724_s21  }
 0x310 PF: > { %p1267_p2 = scmp.ge.s32.totalorder %s1675_s23, 2  ;;  %s762_s7 = sand.u32 1, %s1623_s11  }
 0x311   : > { %p2401_p1 = scmp.ne.s32.totalorder %s2375_s29, 0  ;;  %s763_s10 = scalar_lea.sflag [#allocation7], %s762_s7 }
 0x313   : > { %p1260_p4 = pnand %p1267_p2, %p2401_p1 }
 0x315   : > { %1614 = dma.done.wait (!%p1260_p4), %s763_s10, 128  }
 0x316   : > { %1616 = vsyncadd (!%p1260_p4), %s763_s10, 4294967168  ;;  %s772_s5 = scalar_lea.sflag [#allocation13], %s762_s7 }
 0x317   : > { %1618 = dma.done.wait (!%p1260_p4), %s772_s5, 128  }
 0x318   : > { %1620 = vsyncadd (!%p1260_p4), %s772_s5, 4294967168  ;;  %s34_s23 = sadd.s32 1, %s1675_s23   ;;  %s2403_s6 = sld [smem:[#allocation33_spill]] }
 0x319   : > { %p2261_p12 = scmp.ge.s32.totalorder %s34_s23, 10   ;;  %s2404_s26 = sld [smem:[#allocation24_spill]] }
 0x31a   : > { %s2405_s15 = sld [smem:[#allocation30_spill]]  ;;  %s2406_s29 = sld [smem:[#allocation32_spill]] }
 0x31b   : > { %s2407_s19 = sld [smem:[#allocation27_spill]]  ;;  %s2408_s21 = sld [smem:[#allocation28_spill]] }
 0x31c   : > { %s2409_s3 = sld [smem:[#allocation29_spill]]  ;;  %s2410_s11 = smov %s1627_s12 }
 0x31d   : > { %s2411_s12 = smov %s1631_s13  ;;  %s2413_s14 = smov %s1639_s0 }
 0x31e   : > { %s2412_s13 = smov %s2403_s6  ;;  %s2415_s16 = smov %s1651_s17 }
 0x31f   : > { %s2414_s0 = smov %s2404_s26  ;;  %s2416_s17 = smov %s1655_s18 }
 0x320   : > { %s2417_s18 = smov %s2406_s29  ;;  %s2418_s20 = smov %s1671_s22 }
 0x321   :  { %33 = sbr.rel (!%p2261_p12) target bundleno = 27 (0x1b), region = 144 }
 0x322   : > { %s2419_s22 = smov %s2409_s3 }
 0x328   :  { %777 = vsyncpa [#allocation6], 1 }
 0x329   :  { %779 = vsyncpa [#allocation6 + $0x1], 1 }
 0x32a   :  { %780 = vsyncpa [#allocation9], 1 }
 0x32b   :  { %782 = vsyncpa [#allocation9 + $0x1], 1 }
 0x32c   :  { %783 = vsyncpa [#allocation7], 1 }
 0x32d   :  { %785 = vsyncpa [#allocation7 + $0x1], 1 }
 0x32e   :  { %786 = vsyncpa [#allocation13], 1 }
 0x32f   :  { %788 = vsyncpa [#allocation13 + $0x1], 1 }

</bundles_post_ra>
